<compile_context>
chip_gen: v5e
topology: v5e:2x2
jax: 0.10.0
libtpu: 0.0.40
codegen_flags: <defaults>
</compile_context>

<pallas_src>
import functools

import numpy as np
import jax
import jax.numpy as jnp
from jax import lax
from jax.experimental import pallas as pl
from jax.experimental.pallas import tpu as pltpu


# ----------------------------- glue / parameters -----------------------------

def _padding(i, o, k, s=1, d=1):
    return ((o - 1) * s + (k - 1) * (d - 1) + k - i) // 2


def conv1d_as_matrix(weight, W, pad):
    """M so that flatten_ncw(conv1d(x)) == flatten_ncw(x) @ M (idx = c*W + w)."""
    C_out, C_in, K = weight.shape
    M = np.zeros((C_in * W, C_out * W), dtype=np.float32)
    for co in range(C_out):
        for ci in range(C_in):
            for k in range(K):
                wk = weight[co, ci, k]
                if wk == 0.0:
                    continue
                for wo in range(W):
                    wi = wo + k - pad
                    if 0 <= wi < W:
                        M[ci * W + wi, co * W + wo] = wk
    return M
# TODO(synk): this dense lowering is O(W^2) in memory/FLOPs; before scaling
# image_size (v7x has only 64 MiB VMEM, 32 MiB default scoped) switch to a
# 3-diagonal per-tap representation or tile the 4N gate axis on a grid.


def _reorder_gates(m, n):
    """Reorder last-axis gate blocks [i|g|f|o] -> [i|f|g|o] (128-lane-aligned)."""
    return np.concatenate(
        [m[..., 0:n], m[..., 2 * n:3 * n], m[..., n:2 * n], m[..., 3 * n:4 * n]],
        axis=-1)


# --------------------------- shared in-kernel math ----------------------------

def _lstm_update(gates, hc_prev, lo, n):
    """gates: (B, 4n) cols [i|f|g|o]; hc_prev: (B, 2n) = [h|c]; lo: lane<n mask.

    Sigmoid is applied to ALL gates (including the candidate g) - faithful to
    the quoted PyTorch module.  Returns the new packed [h|c].
    """
    sif = jax.nn.sigmoid(gates[:, :2 * n])                 # [si | sf]
    sgo = jax.nn.sigmoid(gates[:, 2 * n:])                 # [sg | so]
    gc = jnp.where(lo, sgo, hc_prev)                       # [sg | c_prev]
    prod = sif * gc                                        # [si*sg | sf*c_prev]
    c2 = prod + pltpu.roll(prod, n, axis=1)                # [c_new | c_new]
    hgo = sgo * jnp.tanh(c2)                               # [  .   | h_new ]
    return jnp.where(lo, pltpu.roll(hgo, n, axis=1), c2)   # [h_new | c_new]


# ------------------------------ single-step cell ------------------------------

def _cell_kernel(x_ref, h_ref, c_ref, w_ref, b_ref, h_out_ref, c_out_ref,
                 *, num_units):
    n = num_units
    # One merged (B, x_dim+N) x (x_dim+N, 4N) MXU pass.  Inputs are cast to
    # bf16 only at the MXU boundary; gate math stays f32 (v5e: no bf16 VPU/EUP).
    xin = jnp.concatenate([x_ref[...], h_ref[...]], axis=1).astype(jnp.bfloat16)
    gates = jnp.dot(xin, w_ref[...],
                    preferred_element_type=jnp.float32) + b_ref[...]
    hc_prev = jnp.concatenate([h_ref[...], c_ref[...]], axis=1)
    lo = lax.broadcasted_iota(jnp.int32, hc_prev.shape, 1) < n
    hc = _lstm_update(gates, hc_prev, lo, n)
    h_out_ref[...] = hc[:, :n].astype(h_out_ref.dtype)
    c_out_ref[...] = hc[:, n:].astype(c_out_ref.dtype)


def row_lstm_cell_pallas(x_flat, c_prev, h_prev, w_cat, bias, num_units):
    """One RowLSTMCell step; returns (h, (c, h)) like the PyTorch forward."""
    B = x_flat.shape[0]
    vmem = pl.BlockSpec(memory_space=pltpu.MemorySpace.VMEM)
    h, c = pl.pallas_call(
        functools.partial(_cell_kernel, num_units=num_units),
        out_shape=(jax.ShapeDtypeStruct((B, num_units), jnp.float32),
                   jax.ShapeDtypeStruct((B, num_units), jnp.float32)),
        in_specs=[vmem] * 5,
        out_specs=(vmem, vmem),
        compiler_params=pltpu.CompilerParams(
            vmem_limit_bytes=32 * 1024 * 1024),
    )(x_flat, h_prev, c_prev, w_cat, bias)
    return h, (c, h)


# -------------------------- fused per-row sequence ----------------------------

def _rows_kernel(x2d_ref, h0_ref, c0_ref, wx_ref, wh_ref, b_ref,
                 h_seq_ref, c_last_ref, h_last_ref, *, num_units, n_rows, batch):
    n = num_units

    # Phase 0 (off the recurrent critical path): input projections for ALL rows
    # in ONE MXU pass (M = n_rows*batch), bias folded in so the serial loop
    # carries no bias add.
    gates_x = jnp.dot(x2d_ref[...], wx_ref[...],
                      preferred_element_type=jnp.float32) + b_ref[...]

    # Phase 1: serial recurrence.  Loop invariants hoisted: recurrent weight
    # read once, lane mask built once; the packed [h|c] state stays in vregs.
    wh = wh_ref[...]
    lo = lax.broadcasted_iota(jnp.int32, (batch, 2 * n), 1) < n
    hc = jnp.concatenate([h0_ref[...], c0_ref[...]], axis=1)

    # n_rows is small and static: full unroll lets the LLO scheduler overlap
    # MXU / EUP / XLU work across adjacent rows.
    for r in range(n_rows):
        gates = gates_x[r * batch:(r + 1) * batch] + jnp.dot(
            hc[:, :n].astype(jnp.bfloat16), wh,
            preferred_element_type=jnp.float32)
        hc = _lstm_update(gates, hc, lo, n)
        h_seq_ref[r] = hc[:, :n].astype(h_seq_ref.dtype)

    h_last_ref[...] = hc[:, :n].astype(h_last_ref.dtype)
    c_last_ref[...] = hc[:, n:].astype(c_last_ref.dtype)


def row_lstm_rows_pallas(x_seq, c0, h0, w_x, w_h, bias, num_units):
    """All image rows in ONE pallas_call / ONE kernel invocation.

    x_seq: (R, B, x_dim) f32; w_x (x_dim, 4N) / w_h (N, 4N) bf16; bias (1,4N) f32.
    Returns (h_seq (R,B,N), (c_last, h_last)).
    """
    R, B, xd = x_seq.shape
    n = num_units
    # Contiguous reshape is free; bf16 cast halves x's HBM->VMEM traffic.
    x2d = x_seq.reshape(R * B, xd).astype(jnp.bfloat16)
    vmem = pl.BlockSpec(memory_space=pltpu.MemorySpace.VMEM)
    h_seq, c_last, h_last = pl.pallas_call(
        functools.partial(_rows_kernel, num_units=n, n_rows=R, batch=B),
        out_shape=(jax.ShapeDtypeStruct((R, B, n), jnp.float32),
                   jax.ShapeDtypeStruct((B, n), jnp.float32),
                   jax.ShapeDtypeStruct((B, n), jnp.float32)),
        in_specs=[vmem] * 6,
        out_specs=(vmem, vmem, vmem),
        compiler_params=pltpu.CompilerParams(
            vmem_limit_bytes=32 * 1024 * 1024),
    )(x2d, h0, c0, w_x, w_h, bias)
    # TODO(synk): on v7x (2 TensorCores/chip) shard an independent axis
    # (batch shards / separate images) across cores with a leading "parallel"
    # grid axis; the row recurrence itself must stay serial.
    return h_seq, (c_last, h_last)


# ------------------------------ pure-JAX reference ----------------------------

def _q_bf16(a):
    """Round-trip through bf16: emulates the kernel's MXU-input quantization."""
    return a.astype(jnp.bfloat16).astype(jnp.float32)


def row_lstm_cell_ref(x_flat, c_prev, h_prev, w_is_masked, b_is, w_ss, b_ss,
                      hidden_dims, channel_in, image_size):
    B = x_flat.shape[0]
    hB = _q_bf16(h_prev).reshape(B, hidden_dims, image_size)
    xB = _q_bf16(x_flat).reshape(B, channel_in, image_size)
    dn = ('NCH', 'OIH', 'NCH')
    s_s = lax.conv_general_dilated(hB, _q_bf16(w_ss), (1,), [(1, 1)],
                                   dimension_numbers=dn,
                                   precision=lax.Precision.HIGHEST
                                   ) + b_ss[None, :, None]
    i_s = lax.conv_general_dilated(xB, _q_bf16(w_is_masked), (1,), [(1, 1)],
                                   dimension_numbers=dn,
                                   precision=lax.Precision.HIGHEST
                                   ) + b_is[None, :, None]
    num_units = hidden_dims * image_size
    lstm = jax.nn.sigmoid(s_s.reshape(B, 4 * num_units)
                          + i_s.reshape(B, 4 * num_units))
    i, g, f, o = jnp.split(lstm, 4, axis=1)
    c = f * c_prev + i * g
    h = o * jnp.tanh(c)
    return h, c


# ------------------------------------ main ------------------------------------

if __name__ == "__main__":
    hidden_dims = 4
    channel_in = 4      # module forward requires channel_in == hidden_dims
    image_size = 16
    batch = 2
    n_rows = 8          # rows fused by the sequence kernel
    num_units = hidden_dims * image_size          # 64
    x_dim = channel_in * image_size               # 64
    pad = _padding(image_size, image_size, 3)     # == 1

    key = jax.random.PRNGKey(0)
    k1, k2, k3, k4, k5, k6, k7, k8 = jax.random.split(key, 8)

    # Deterministic synthetic parameters (shapes from the module __init__).
    w_is = 0.1 * jax.random.normal(k1, (4 * hidden_dims, hidden_dims, 3), jnp.float32)
    b_is = 0.1 * jax.random.normal(k2, (4 * hidden_dims,), jnp.float32)
    w_ss = 0.1 * jax.random.normal(k3, (4 * hidden_dims, channel_in, 3), jnp.float32)
    b_ss = 0.1 * jax.random.normal(k4, (4 * hidden_dims,), jnp.float32)

    # MaskedConv1d mask 'B', K=3: taps >= K//2 + 1 == 2 are zeroed.
    mask = np.ones((4 * hidden_dims, hidden_dims, 3), dtype=np.float32)
    mask[:, :, 2:] = 0.0
    w_is_masked = w_is * jnp.asarray(mask)

    # Lower convs to dense banded matrices; reorder gate cols [i|g|f|o]->[i|f|g|o].
    m_is = _reorder_gates(
        conv1d_as_matrix(np.asarray(w_is_masked), image_size, pad), num_units)
    m_ss = _reorder_gates(
        conv1d_as_matrix(np.asarray(w_ss), image_size, pad), num_units)
    bias_np = _reorder_gates(np.repeat(np.asarray(b_is), image_size)
                             + np.repeat(np.asarray(b_ss), image_size), num_units)

    # Weights in bf16 (MXU-native on all gens); bias stays f32 (added post-MXU).
    w_cat = jnp.asarray(np.concatenate([m_is, m_ss], axis=0)).astype(jnp.bfloat16)
    w_x = jnp.asarray(m_is).astype(jnp.bfloat16)      # x -> gates
    w_h = jnp.asarray(m_ss).astype(jnp.bfloat16)      # h -> gates (no zero c-half)
    bias = jnp.asarray(bias_np).reshape(1, 4 * num_units)

    # Inputs / states (flattened NCW layout, as the module's .view implies).
    x_flat = jax.random.normal(k5, (batch, x_dim), jnp.float32)
    c_prev = jax.random.normal(k6, (batch, num_units), jnp.float32)
    h_prev = jax.random.normal(k7, (batch, num_units), jnp.float32)
    x_seq = jax.random.normal(k8, (n_rows, batch, x_dim), jnp.float32)

    # --- single-step cell (module.forward) ---
    h_out, (c_out, _) = row_lstm_cell_pallas(
        x_flat, c_prev, h_prev, w_cat, bias, num_units)
    jax.block_until_ready((h_out, c_out))

    h_ref, c_ref = row_lstm_cell_ref(
        x_flat, c_prev, h_prev, w_is_masked, b_is, w_ss, b_ss,
        hidden_dims, channel_in, image_size)
    assert h_out.shape == (batch, num_units) and c_out.shape == (batch, num_units)
    assert np.allclose(np.asarray(h_out), np.asarray(h_ref), rtol=1e-4, atol=1e-5)
    assert np.allclose(np.asarray(c_out), np.asarray(c_ref), rtol=1e-4, atol=1e-5)

    # --- fused row sequence (one pallas_call, one grid step, for all rows) ---
    h_seq, (c_last, h_last) = row_lstm_rows_pallas(
        x_seq, c_prev, h_prev, w_x, w_h, bias, num_units)
    jax.block_until_ready((h_seq, c_last, h_last))

    h_r, c_r = h_prev, c_prev
    h_seq_ref = []
    for r in range(n_rows):
        h_r, c_r = row_lstm_cell_ref(
            x_seq[r], c_r, h_r, w_is_masked, b_is, w_ss, b_ss,
            hidden_dims, channel_in, image_size)
        h_seq_ref.append(h_r)
    h_seq_ref = jnp.stack(h_seq_ref)

    # Looser tolerance for the recurrence: the carried h is re-quantized to
    # bf16 at the MXU boundary each row, so kernel/reference can differ by a
    # bf16 ulp at rounding boundaries (bounded, contractive downstream).
    assert np.allclose(np.asarray(h_seq), np.asarray(h_seq_ref), rtol=1e-3, atol=1e-3)
    assert np.allclose(np.asarray(c_last), np.asarray(c_r), rtol=1e-3, atol=1e-3)
    assert np.allclose(np.asarray(h_last), np.asarray(h_r), rtol=1e-3, atol=1e-3)

    print("KERNEL_OK")
</pallas_src>

<mosaic_0001>
module attributes {stable_mosaic.version = 11 : i64} {
  func.func @_cell_kernel(%arg0: memref<2x64xf32, #tpu.memory_space<vmem>>, %arg1: memref<2x64xf32, #tpu.memory_space<vmem>>, %arg2: memref<2x64xf32, #tpu.memory_space<vmem>>, %arg3: memref<128x256xbf16, #tpu.memory_space<vmem>>, %arg4: memref<1x256xf32, #tpu.memory_space<vmem>>, %arg5: memref<2x64xf32, #tpu.memory_space<vmem>>, %arg6: memref<2x64xf32, #tpu.memory_space<vmem>>) attributes {dimension_semantics = [], scalar_prefetch = 0 : i64, scratch_operands = 0 : i64, tpu.core_type = #tpu.core_type<tc>} {
    %c0 = arith.constant 0 : index
    %c0_0 = arith.constant 0 : index
    %0 = vector.load %arg0[%c0, %c0_0] : memref<2x64xf32, #tpu.memory_space<vmem>>, vector<2x64xf32>
    %c0_1 = arith.constant 0 : index
    %c0_2 = arith.constant 0 : index
    %1 = vector.load %arg1[%c0_1, %c0_2] : memref<2x64xf32, #tpu.memory_space<vmem>>, vector<2x64xf32>
    %2 = tpu.concatenate %0, %1 in 1 : vector<2x64xf32>, vector<2x64xf32> -> vector<2x128xf32>
    %3 = arith.truncf %2 : vector<2x128xf32> to vector<2x128xbf16>
    %c0_3 = arith.constant 0 : index
    %c0_4 = arith.constant 0 : index
    %4 = vector.load %arg3[%c0_3, %c0_4] : memref<128x256xbf16, #tpu.memory_space<vmem>>, vector<128x256xbf16>
    %cst = arith.constant dense<0.000000e+00> : vector<2x256xf32>
    %5 = tpu.matmul %3, %4, %cst {dimension_numbers = #tpu.dot_dimension_numbers<[1], [0], [0], [1], [0, 0, 1, 1], [], []>} : vector<2x128xbf16>, vector<128x256xbf16>, vector<2x256xf32> -> vector<2x256xf32>
    %c0_5 = arith.constant 0 : index
    %c0_6 = arith.constant 0 : index
    %6 = vector.load %arg4[%c0_5, %c0_6] : memref<1x256xf32, #tpu.memory_space<vmem>>, vector<1x256xf32>
    %7 = vector.broadcast %6 : vector<1x256xf32> to vector<2x256xf32>
    %8 = arith.addf %5, %7 : vector<2x256xf32>
    %c0_7 = arith.constant 0 : index
    %c0_8 = arith.constant 0 : index
    %9 = vector.load %arg1[%c0_7, %c0_8] : memref<2x64xf32, #tpu.memory_space<vmem>>, vector<2x64xf32>
    %c0_9 = arith.constant 0 : index
    %c0_10 = arith.constant 0 : index
    %10 = vector.load %arg2[%c0_9, %c0_10] : memref<2x64xf32, #tpu.memory_space<vmem>>, vector<2x64xf32>
    %11 = tpu.concatenate %9, %10 in 1 : vector<2x64xf32>, vector<2x64xf32> -> vector<2x128xf32>
    %12 = tpu.iota {dimensions = array<i32: 1>} : vector<2x128xi32>
    %c64_i32 = arith.constant 64 : i32
    %13 = vector.broadcast %c64_i32 : i32 to vector<2x128xi32>
    %14 = arith.cmpi slt, %12, %13 : vector<2x128xi32>
    %15 = vector.extract_strided_slice %8 {offsets = [0, 0], sizes = [2, 128], strides = [1, 1]} : vector<2x256xf32> to vector<2x128xf32>
    %16 = arith.negf %15 : vector<2x128xf32>
    %17 = math.exp %16 : vector<2x128xf32>
    %cst_11 = arith.constant 1.000000e+00 : f32
    %18 = vector.broadcast %cst_11 : f32 to vector<2x128xf32>
    %19 = arith.addf %18, %17 : vector<2x128xf32>
    %20 = arith.divf %18, %19 : vector<2x128xf32>
    %21 = vector.extract_strided_slice %8 {offsets = [0, 128], sizes = [2, 128], strides = [1, 1]} : vector<2x256xf32> to vector<2x128xf32>
    %22 = arith.negf %21 : vector<2x128xf32>
    %23 = math.exp %22 : vector<2x128xf32>
    %cst_12 = arith.constant 1.000000e+00 : f32
    %24 = vector.broadcast %cst_12 : f32 to vector<2x128xf32>
    %25 = arith.addf %24, %23 : vector<2x128xf32>
    %26 = arith.divf %24, %25 : vector<2x128xf32>
    %27 = arith.select %14, %26, %11 : vector<2x128xi1>, vector<2x128xf32>
    %28 = arith.mulf %20, %27 : vector<2x128xf32>
    %c64_i32_13 = arith.constant 64 : i32
    %29 = tpu.dynamic_rotate %28 by %c64_i32_13 dim 1 : vector<2x128xf32>, i32 -> vector<2x128xf32>
    %30 = arith.addf %28, %29 : vector<2x128xf32>
    %31 = math.tanh %30 : vector<2x128xf32>
    %32 = arith.mulf %26, %31 : vector<2x128xf32>
    %c64_i32_14 = arith.constant 64 : i32
    %33 = tpu.dynamic_rotate %32 by %c64_i32_14 dim 1 : vector<2x128xf32>, i32 -> vector<2x128xf32>
    %34 = arith.select %14, %33, %30 : vector<2x128xi1>, vector<2x128xf32>
    %35 = vector.extract_strided_slice %34 {offsets = [0, 0], sizes = [2, 64], strides = [1, 1]} : vector<2x128xf32> to vector<2x64xf32>
    %c0_15 = arith.constant 0 : index
    %c0_16 = arith.constant 0 : index
    %36 = vector.load %arg5[%c0_15, %c0_16] : memref<2x64xf32, #tpu.memory_space<vmem>>, vector<2x64xf32>
    tpu.vector_store %arg5[%c0_15, %c0_16], %35 {strides = array<i32>} : memref<2x64xf32, #tpu.memory_space<vmem>>, vector<2x64xf32>,
    %37 = vector.extract_strided_slice %34 {offsets = [0, 64], sizes = [2, 64], strides = [1, 1]} : vector<2x128xf32> to vector<2x64xf32>
    %c0_17 = arith.constant 0 : index
    %c0_18 = arith.constant 0 : index
    %38 = vector.load %arg6[%c0_17, %c0_18] : memref<2x64xf32, #tpu.memory_space<vmem>>, vector<2x64xf32>
    tpu.vector_store %arg6[%c0_17, %c0_18], %37 {strides = array<i32>} : memref<2x64xf32, #tpu.memory_space<vmem>>, vector<2x64xf32>,
    return
  }
}

</mosaic_0001>

<bundles_post_ra>
// kernel: tpu_custom_call.1
= control target key start
LH: loop header
LB: loop body
LE: loop exit
PB: predicated region body
PF: predicated region fallthrough
CT: control target
= control target key end

     0   :  { %12 = vsyncpa [#allocation3], 0  ;;  %s650_s0 = inlined_call_operand.hbm [shape: f32[2,64], index: 0, kind: input, shape index: {}]   ;;  %s651_s1 = inlined_call_operand.hbm [shape: f32[2,64], index: 1, kind: input, shape index: {}]   ;;  %s652_s2 = inlined_call_operand.hbm [shape: f32[2,64], index: 2, kind: input, shape index: {}]   ;;  %s653_s3 = inlined_call_operand.hbm [shape: bf16[128,256], index: 3, kind: input, shape index: {}]   ;;  %s654_s4 = inlined_call_operand.vmem [shape: f32[1,256], index: 4, kind: input, shape index: {}]   ;;  %s655_s5 = inlined_call_operand.hbm [shape: f32[2,64], index: 5, kind: output, shape index: {0}]   ;;  %s656_s6 = inlined_call_operand.hbm [shape: f32[2,64], index: 6, kind: output, shape index: {1}]  }
   0x1   :  { %13 = vsyncpa [#allocation6], 0 }
   0x2   :  { %14 = vsyncpa [#allocation9], 0 }
   0x3   :  { %15 = vsyncpa [#allocation4], 0  ;;  %s33_s23 = sshll.u32 %s651_s1, 4  ;;  %s34_s23 = int_to_ptr.hbm [resolvable:$true] %s33_s23 }
   0x4   :  { %16 = vsyncpa [#allocation12], 0  ;;  %s572_s24 = smov [#allocation5]   ;;  %s22_s28 = sshll.u32 %s650_s0, 4  ;;  %s23_s28 = int_to_ptr.hbm [resolvable:$true] %s22_s28 }
   0x5   :  { %s35_s25 = sshll.u32 %s572_s24, 4  ;;  %s573_s29 = smov [#allocation2]   ;;  %s36_s25 = int_to_ptr.vmem [resolvable:$true] %s35_s25 }
   0x6   :  { %38 = dma.hbm_to_vmem [thread:$0]  %s34_s23, 32, %s36_s25, [#allocation6]  }
   0x7   :  { %s24_s30 = sshll.u32 %s573_s29, 4  ;;  %s44_s9 = sshll.u32 %s652_s2, 4  ;;  %s25_s30 = int_to_ptr.vmem [resolvable:$true] %s24_s30  ;;  %s45_s9 = int_to_ptr.hbm [resolvable:$true] %s44_s9 }
   0x8   :  { %27 = dma.hbm_to_vmem [thread:$0]  %s23_s28, 32, %s25_s30, [#allocation3]  }
   0x9   :  { %s54_s11 = sshll.u32 %s653_s3, 4  ;;  %s574_s12 = smov [#allocation7]   ;;  %s55_s11 = int_to_ptr.hbm [resolvable:$true] %s54_s11 }
   0xa   :  { %s46_s13 = sshll.u32 %s574_s12, 4  ;;  %s575_s0 = smov [#allocation8]   ;;  %s47_s13 = int_to_ptr.vmem [resolvable:$true] %s46_s13 }
   0xb   :  { %49 = dma.hbm_to_vmem [thread:$0]  %s45_s9, 32, %s47_s13, [#allocation6]  }
   0xc   :  { %s56_s14 = sshll.u32 %s575_s0, 4  ;;  %s576_s15 = smov 128   ;;  %s57_s14 = int_to_ptr.vmem [resolvable:$true] %s56_s14 }
   0xd   :  { %s577_s16 = smov 8  }
   0xe   :  { %62 = dma.hbm_to_vmem [thread:$0]  %s55_s11, 2048, %s57_s14, [#allocation9], %s576_s15, %s576_s15, %s577_s16  }
   0xf   :  { %562 = dma.done.wait [#allocation3], 32  }
  0x10   :  { %563 = vsyncadd [#allocation3], 4294967264 }
  0x11   :  { %564 = dma.done.wait [#allocation6], 64  }
  0x12   :  { %565 = vsyncadd [#allocation6], 4294967232 }
  0x13   :  { %566 = dma.done.wait [#allocation9], 2048  }
  0x14   :  { %567 = vsyncadd [#allocation9], 4294965248  ;;  %v628_v0 = vld [vmem:[#allocation5] sm:$0x3]  ;;  %v375_v1 = vld [vmem:[#allocation8 + $0x70] sm:$0xf] }
  0x15   :  { %v398_v2 = vld [vmem:[#allocation8 + $0x74] sm:$0xf0]  ;;  %s578_s2 = smov 64   ;;  %v397_v4 = vld [vmem:[#allocation8 + $0x74] sm:$0xf]  ;;  %vm87_vm0 = vcmask 523264  }
  0x16   :  { %84 = vrot.lane.b32.xlu0 %v628_v0, %s578_s2  ;;  %v376_v3 = vor.u32 %v398_v2, %v375_v1  ;;  %v377_v5 = vld [vmem:[#allocation8 + $0x78] sm:$0xf0]  ;;  %v367_v6 = vld [vmem:[#allocation8 + $0x60] sm:$0xf]  ;;  %v396_v8 = vld [vmem:[#allocation8 + $0x64] sm:$0xf0] }
  0x17   :  { %v380_v7 = vor.u32 %v397_v4, %v377_v5  ;;  %v395_v9 = vld [vmem:[#allocation8 + $0x64] sm:$0xf]  ;;  %v369_v10 = vld [vmem:[#allocation8 + $0x68] sm:$0xf0]  ;;  %v368_v11 = vor.u32 %v396_v8, %v367_v6  ;;  %v359_v13 = vld [vmem:[#allocation8 + $0x50] sm:$0xf] }
  0x18   :  { %192 = vmatpush.bf16.msra.mxu0 %v376_v3  ;;  %v372_v12 = vor.u32 %v395_v9, %v369_v10  ;;  %v394_v14 = vld [vmem:[#allocation8 + $0x54] sm:$0xf0]  ;;  %v393_v15 = vld [vmem:[#allocation8 + $0x54] sm:$0xf]  ;;  %v361_v16 = vld [vmem:[#allocation8 + $0x58] sm:$0xf0] }
  0x19   :  { %205 = vmatpush.bf16.msra.mxu1 %v380_v7  ;;  %v360_v17 = vor.u32 %v394_v14, %v359_v13  ;;  %v364_v18 = vor.u32 %v393_v15, %v361_v16  ;;  %v351_v19 = vld [vmem:[#allocation8 + $0x40] sm:$0xf]  ;;  %v392_v20 = vld [vmem:[#allocation8 + $0x44] sm:$0xf0]  ;;  %v391_v21 = vld [vmem:[#allocation8 + $0x44] sm:$0xf]  ;;  %v224_v7 = vlaneseq }
  0x1a   :  { %v353_v22 = vld [vmem:[#allocation8 + $0x48] sm:$0xf0]  ;;  %v352_v23 = vor.u32 %v392_v20, %v351_v19  ;;  %v343_v25 = vld [vmem:[#allocation8 + $0x30] sm:$0xf]  ;;  %v390_v26 = vld [vmem:[#allocation8 + $0x34] sm:$0xf0] }
  0x1b   :  { %v356_v24 = vor.u32 %v391_v21, %v353_v22  ;;  %v389_v27 = vld [vmem:[#allocation8 + $0x34] sm:$0xf]  ;;  %v345_v28 = vld [vmem:[#allocation8 + $0x38] sm:$0xf0]  ;;  %v344_v29 = vor.u32 %v390_v26, %v343_v25  ;;  %v335_v31 = vld [vmem:[#allocation8 + $0x20] sm:$0xf] }
  0x1c   :  { %193 = vmatpush.bf16.msra.mxu0 %v368_v11  ;;  %v348_v30 = vor.u32 %v389_v27, %v345_v28  ;;  %v388_v32 = vld [vmem:[#allocation8 + $0x24] sm:$0xf0]  ;;  %v387_v33 = vld [vmem:[#allocation8 + $0x24] sm:$0xf]  ;;  %v337_v34 = vld [vmem:[#allocation8 + $0x28] sm:$0xf0] }
  0x1d   :  { %206 = vmatpush.bf16.msra.mxu1 %v372_v12  ;;  %v336_v35 = vor.u32 %v388_v32, %v335_v31  ;;  %v340_v36 = vor.u32 %v387_v33, %v337_v34  ;;  %v327_v37 = vld [vmem:[#allocation8 + $0x10] sm:$0xf]  ;;  %v386_v38 = vld [vmem:[#allocation8 + $0x14] sm:$0xf0]  ;;  %v385_v39 = vld [vmem:[#allocation8 + $0x14] sm:$0xf] }
  0x1e   :  { %v329_v40 = vld [vmem:[#allocation8 + $0x18] sm:$0xf0]  ;;  %v328_v41 = vor.u32 %v386_v38, %v327_v37  ;;  %v319_v43 = vld [vmem:[#allocation8] sm:$0xf]  ;;  %v384_v44 = vld [vmem:[#allocation8 + $0x4] sm:$0xf0] }
  0x1f   :  { %v332_v42 = vor.u32 %v385_v39, %v329_v40  ;;  %v383_v45 = vld [vmem:[#allocation8 + $0x4] sm:$0xf]  ;;  %v320_v46 = vor.u32 %v384_v44, %v319_v43  ;;  %v321_v47 = vld [vmem:[#allocation8 + $0x8] sm:$0xf0]  ;;  %v218_v49 = vld [vmem:[#allocation7] sm:$0x3] }
  0x20   :  { %194 = vmatpush.bf16.msra.mxu0 %v360_v17  ;;  %v324_v48 = vor.u32 %v383_v45, %v321_v47  ;;  %220 = vrot.lane.b32.xlu0 %v218_v49, %s578_s2  ;;  %v81_v50 = vld [vmem:[#allocation2] sm:$0x3]  ;;  %v225_v12 = vand.u32 127, %v224_v7  ;;  %s289_s21 = sshll.u32 %s655_s5, 4  ;;  %vm275_vm10 = vcmask 517120   ;;  %s580_s22 = smov [#allocation11]   ;;  %s290_s21 = int_to_ptr.hbm [resolvable:$true] %s289_s21 }
  0x21   :  { %207 = vmatpush.bf16.msra.mxu1 %v364_v18  ;;  %v106_v54 = vld [vmem:[%s654_s4] sm:$0x3]  ;;  %s579_s4 = smov [#allocation10]   ;;  %s298_s23 = sshll.u32 %s580_s22, 4  ;;  %s299_s23 = int_to_ptr.vmem [resolvable:$true] %s298_s23 }
  0x22   :  { %v108_v55 = vperm.slane %v106_v54, 0  ;;  %v109_v56 = vperm.slane %v106_v54, 1  ;;  %vm226_vm6 = vcmp.lt.s32.totalorder %v225_v12, 64  ;;  %s287_s18 = sshll.u32 %s579_s4, 4  ;;  %s300_s26 = sshll.u32 %s656_s6, 4  ;;  %s288_s18 = int_to_ptr.vmem [resolvable:$true] %s287_s18  ;;  %s301_s26 = int_to_ptr.hbm [resolvable:$true] %s300_s26 }
  0x24   :  { %195 = vmatpush.bf16.msra.mxu0 %v352_v23 }
  0x25   :  { %208 = vmatpush.bf16.msra.mxu1 %v356_v24 }
  0x28   :  { %196 = vmatpush.bf16.msra.mxu0 %v344_v29 }
  0x29   :  { %209 = vmatpush.bf16.msra.mxu1 %v348_v30 }
  0x2c   :  { %197 = vmatpush.bf16.msra.mxu0 %v336_v35 }
  0x2d   :  { %210 = vmatpush.bf16.msra.mxu1 %v340_v36 }
  0x30   :  { %198 = vmatpush.bf16.msra.mxu0 %v328_v41 }
  0x31   :  { %211 = vmatpush.bf16.msra.mxu1 %v332_v42 }
  0x34   :  { %199 = vmatpush.bf16.msra.mxu0 %v320_v46 }
  0x35   :  { %212 = vmatpush.bf16.msra.mxu1 %v324_v48 }
  0x88   :  { %v85_v51 = vpop.permute.xlu0 %84 }
  0x89   :  { %v88_v52 = vsel %vm87_vm0, %v81_v50, %v85_v51 }
  0x8a   :  { %v89_v53 = vpack.c.bf16 %v88_v52, %v88_v52 }
  0x8c   :  { %200 = vmatmul.bf16.vlgmr.msra.gmra.mxu0 %v89_v53  ;;  %213 = vmatmul.bf16.vlgmr.msra.gmra.mxu1 %v89_v53 }
  0x92   :  { %v221_v15 = vpop.permute.xlu0 %220 }
  0x93   :  { %v223_v22 = vsel %vm87_vm0, %v628_v0, %v221_v15 }
 0x109   :  { %v201_v57 = vpop.f32.mrf.mxu0  ;;  %v214_v58 = vpop.f32.mrf.mxu1 }
 0x10a   :  { %v202_v59 = vadd.f32 %v201_v57, %v108_v55  ;;  %v215_v60 = vadd.f32 %v214_v58, %v109_v56 }
 0x10c   :  { %v381_v61 = vmul.f32 -1.442695, %v202_v59  ;;  %v382_v62 = vmul.f32 -1.442695, %v215_v60 }
 0x10e   :  { %408 = vpow2.f32 %v381_v61 }
 0x10f   :  { %410 = vpow2.f32 %v382_v62 }
 0x111   :  { %v203_v63 = vpop.f32.mrf.mxu0  ;;  %v216_v1 = vpop.f32.mrf.mxu1 }
 0x114   :  { %v409_v2 = vpop.eup %408 }
 0x115   :  { %v411_v3 = vpop.eup %410  ;;  %v230_v4 = vadd.f32 1.0, %v409_v2 }
 0x116   :  { %v249_v5 = vadd.f32 1.0, %v411_v3 }
 0x117   :  { %412 = vrcp.f32 %v230_v4  ;;  %v242_v13 = vand.u32 2147483648, %v230_v4  ;;  %v240_v17 = vand.u32 2147483647, %v230_v4  ;;  %vm236_vm3 = vweird.f32 %v230_v4 }
 0x118   :  { %414 = vrcp.f32 %v249_v5  ;;  %v261_v18 = vand.u32 2147483648, %v249_v5  ;;  %v259_v20 = vand.u32 2147483647, %v249_v5  ;;  %vm255_vm5 = vweird.f32 %v249_v5 }
 0x119   :  { %v243_v23 = vor.u32 1.1754944e-38, %v242_v13  ;;  %vm241_vm7 = vcmp.eq.f32.partialorder %v240_v17, 8.507059e+37 }
 0x11a   :  { %v262_v26 = vor.u32 1.1754944e-38, %v261_v18  ;;  %vm260_vm9 = vcmp.eq.f32.partialorder %v259_v20, 8.507059e+37 }
 0x11d   :  { %v413_v6 = vpop.eup %412 }
 0x11e   :  { %v415_v8 = vpop.eup %414  ;;  %v232_v9 = vmul.f32 %v413_v6, %v230_v4  ;;  %vm237_vm1 = vweird.f32 %v413_v6 }
 0x11f   :  { %v251_v10 = vmul.f32 %v415_v8, %v249_v5  ;;  %vm256_vm2 = vweird.f32 %v415_v8  ;;  %vm238_vm4 = vmor %vm236_vm3, %vm237_vm1 }
 0x120   :  { %v233_v11 = vsub.f32 1.0, %v232_v9  ;;  %vm257_vm8 = vmor %vm255_vm5, %vm256_vm2 }
 0x121   :  { %v252_v14 = vsub.f32 1.0, %v251_v10 }
 0x122   :  { %v234_v16 = vmul.f32 %v413_v6, %v233_v11 }
 0x123   :  { %v253_v19 = vmul.f32 %v415_v8, %v252_v14 }
 0x124   :  { %v235_v21 = vadd.f32 %v413_v6, %v234_v16 }
 0x125   :  { %v254_v24 = vadd.f32 %v415_v8, %v253_v19 }
 0x126   :  { %v239_v25 = vsel %vm238_vm4, %v413_v6, %v235_v21 }
 0x127   :  { %v244_v27 = vsel %vm241_vm7, %v243_v23, %v239_v25  ;;  %v258_v28 = vsel %vm257_vm8, %v415_v8, %v254_v24 }
 0x128   :  { %v263_v29 = vsel %vm260_vm9, %v262_v26, %v258_v28 }
 0x129   :  { %v265_v30 = vsel %vm226_vm6, %v263_v29, %v223_v22 }
 0x12a   :  { %v266_v31 = vmul.f32 %v265_v30, %v244_v27 }
 0x12c   :  { %267 = vrot.lane.b32.xlu1 %v266_v31, %s578_s2 }
 0x19e   :  { %v268_v32 = vpop.permute.xlu1 %267 }
 0x19f   :  { %v269_v0 = vadd.f32 %v268_v32, %v266_v31 }
 0x1a1   :  { %416 = vtanh.f32 %v269_v0 }
 0x1a7   :  { %v417_v33 = vpop.eup %416 }
 0x1a8   :  { %v271_v34 = vmul.f32 %v417_v33, %v263_v29 }
 0x1aa   :  { %272 = vrot.lane.b32.xlu1 %v271_v34, %s578_s2 }
 0x21c   :  { %v273_v35 = vpop.permute.xlu1 %272 }
 0x21d   :  { %v274_v36 = vsel %vm226_vm6, %v273_v35, %v269_v0 }
 0x21e   :  { %278 = vrot.lane.b32.xlu2 %v274_v36, %s578_s2  ;;  %276 = vst.msk [vmem:[#allocation10] sm:$0x3] %vm275_vm10, %v274_v36 }
 0x21f   :  { %292 = dma.vmem_to_hbm [thread:$0]  %s288_s18, 32, %s290_s21, [#allocation4]  }
 0x278   :  { %v279_v37 = vpop.permute.xlu2 %278 }
 0x279   :  { %281 = vst.msk [vmem:[#allocation11] sm:$0x3] %vm275_vm10, %v279_v37 }
 0x27a   :  { %303 = dma.vmem_to_hbm [thread:$0]  %s299_s23, 32, %s301_s26, [#allocation12]  }
 0x27b   :  { %568 = dma.done.wait [#allocation4], 32  }
 0x27c   :  { %569 = vsyncadd [#allocation4], 4294967264 }
 0x27d   :  { %570 = dma.done.wait [#allocation12], 32  }
 0x27e   :  { %571 = vsyncadd [#allocation12], 4294967264 }
 0x27f   :  { %312 = vsyncpa [#allocation3], 1 }
 0x280   :  { %313 = vsyncpa [#allocation6], 1 }
 0x281   :  { %314 = vsyncpa [#allocation9], 1 }
 0x282   :  { %315 = vsyncpa [#allocation4], 1 }
 0x283   :  { %316 = vsyncpa [#allocation12], 1 }

</bundles_post_ra>
